<compile_context>
chip_gen: v6e
topology: v6e:2x2x1
jax: 0.10.0
libtpu: 0.0.40
codegen_flags: <defaults>
</compile_context>

<pallas_src>
import jax
import jax.numpy as jnp
from jax.experimental import pallas as pl
from jax.experimental.pallas import tpu as pltpu


def _identity_kernel(x_hbm_ref, o_hbm_ref, done_ref):
    # The output HBM buffer is aliased to the input buffer, so the identity
    # needs no data movement whatsoever.  The single SMEM scalar store below
    # is a zero-cost marker that keeps the TensorCore program non-empty; it
    # never touches HBM or VMEM.
    del x_hbm_ref, o_hbm_ref  # intentionally untouched (aliased, already correct)
    done_ref[0] = jnp.int32(1)


@jax.jit
def se_module_forward(x: jax.Array) -> jax.Array:
    """Pallas implementation of SEModule.forward (identity)."""
    return pl.pallas_call(
        _identity_kernel,
        out_shape=jax.ShapeDtypeStruct(x.shape, x.dtype),
        # Raw HBM refs: no block DMAs are generated for either operand.
        in_specs=[pl.BlockSpec(memory_space=pl.ANY)],
        out_specs=pl.BlockSpec(memory_space=pl.ANY),
        scratch_shapes=[pltpu.SMEM((1,), jnp.int32)],
        # Highest-value review item: reuse the input HBM buffer for the output
        # (enables donation in the surrounding graph, no fresh allocation, and
        # removes the kernel-side read+write of the whole tensor).
        input_output_aliases={0: 0},
        # Advisory hint: this custom call is free — don't let it block
        # scheduling/overlap of neighboring compute.
        cost_estimate=pl.CostEstimate(flops=0, transcendentals=0, bytes_accessed=0),
    )(x)


if __name__ == "__main__":
    key = jax.random.PRNGKey(0)
    # Small NCHW input consistent with the module's forward signature.
    x = jax.random.normal(key, (2, 4, 16, 16), dtype=jnp.float32)

    y = se_module_forward(x)
    jax.block_until_ready(y)

    # Correctness check against the reference semantics (identity).
    assert y.shape == x.shape and y.dtype == x.dtype
    assert bool(jnp.all(y == x))

    print("KERNEL_OK")
</pallas_src>

<mosaic_0001>
module attributes {stable_mosaic.version = 11 : i64} {
  func.func @_identity_kernel(%arg0: memref<2x4x16x16xf32, #tpu.memory_space<any>>, %arg1: memref<2x4x16x16xf32, #tpu.memory_space<any>>, %arg2: memref<1xi32, #tpu.memory_space<smem>>) attributes {dimension_semantics = [], scalar_prefetch = 0 : i64, scratch_operands = 1 : i64, tpu.core_type = #tpu.core_type<tc>} {
    %c1_i32 = arith.constant 1 : i32
    %c0 = arith.constant 0 : index
    %0 = memref.load %arg2[%c0] : memref<1xi32, #tpu.memory_space<smem>>
    memref.store %c1_i32, %arg2[%c0] : memref<1xi32, #tpu.memory_space<smem>>
    return
  }
}

</mosaic_0001>

<bundles_post_ra>
// kernel: se_module_forward.1
= control target key start
LH: loop header
LB: loop body
LE: loop exit
PB: predicated region body
PF: predicated region fallthrough
CT: control target
= control target key end

     0   :  { %s18_s0 = inlined_call_operand.hbm [shape: f32[2,4,16,16], index: 0, kind: input, shape index: {}, may-alias: {0,1}]   ;;  %s19_s1 = inlined_call_operand.hbm [shape: f32[2,4,16,16], index: 1, kind: output, shape index: {}, may-alias: {0,1}]  }

</bundles_post_ra>
